<compile_context>
chip_gen: v7x
topology: tpu7x:2x2x1
jax: 0.10.0
libtpu: 0.0.40
codegen_flags: <defaults>
</compile_context>

<pallas_src>
import jax
import jax.numpy as jnp
from jax.experimental import pallas as pl
from jax.experimental.pallas import tpu as pltpu


# ---------------------------------------------------------------------------
# Kernel
# ---------------------------------------------------------------------------
def _make_se_kernel(channels_last: bool):
    def se_kernel(x_ref, wd_ref, bd_ref, wu_ref, bu_ref, o_ref):
        x = x_ref[...]                                  # (Nb,C,HW) or (Nb,HW,C)
        if channels_last:
            nb, hw, _ = x.shape
            eq = "blc,blo->bco"
        else:
            nb, _, hw = x.shape
            eq = "bcl,blo->bco"
        inv_hw = 1.0 / float(hw)

        # Squeeze: global average pool as a batched MXU ones-matmul with f32
        # accumulation (avoids casting the whole block to f32 on the VPU).
        ones_v = jnp.ones((nb, hw, 1), dtype=x.dtype)
        pooled = jnp.einsum(eq, x, ones_v,
                            preferred_element_type=jnp.float32)[..., 0]
        pooled = pooled * inv_hw                        # (Nb, C) f32

        # Excitation: C->R (ReLU), R->C (sigmoid). Tiny matmuls, fully in f32.
        h = jnp.dot(pooled, wd_ref[...],
                    preferred_element_type=jnp.float32) + bd_ref[...]
        h = jnp.maximum(h, 0.0)
        s = jnp.dot(h, wu_ref[...],
                    preferred_element_type=jnp.float32) + bu_ref[...]
        s = jax.nn.sigmoid(s)                           # (Nb, C) f32 (EUP slot)

        # Scale: one fused multiply per element, kept in the input dtype.
        s = s.astype(x.dtype)
        if channels_last:
            o_ref[...] = (x * s[:, None, :]).astype(o_ref.dtype)
        else:
            o_ref[...] = (x * s[:, :, None]).astype(o_ref.dtype)

    return se_kernel


# ---------------------------------------------------------------------------
# Generation-keyed budgets & block-size selection
# ---------------------------------------------------------------------------
def _tpu_budgets():
    """(max_block_bytes, vmem_limit_bytes, prefer_even_steps, vmem_capacity)."""
    mib = 1024 * 1024
    vmem_cap = 64 * mib                      # conservative default (v7x per-TC)
    try:
        info = pltpu.get_tpu_info()
        vmem_cap = int(getattr(info, "vmem_capacity_bytes", vmem_cap))
    except Exception:
        pass
    if vmem_cap >= 96 * mib:
        # v5e / v6e: 128 MiB VMEM, one TensorCore -> bigger tiles, fewer steps.
        return 12 * mib, 80 * mib, False, vmem_cap
    # v7x-like: 64 MiB / TC, 2 TensorCores -> tight double-buffered tiles and
    # an even grid-step count so both cores get equal byte counts.
    return 4 * mib, 48 * mib, True, vmem_cap


def _pick_batch_block(n, per_elem_bytes, max_block_bytes, prefer_even_steps):
    """Largest divisor nb of n whose block fits max_block_bytes.
    On two-TensorCore chips prefer an nb that yields an even step count."""
    fitting = [d for d in range(1, n + 1)
               if n % d == 0 and d * per_elem_bytes <= max_block_bytes]
    if not fitting:
        return 1   # a single batch element is already oversized; caller handles
    if prefer_even_steps and n >= 2:
        even = [d for d in fitting if (n // d) % 2 == 0]
        if even:
            return max(even)
    return max(fitting)


_BUFFERED = getattr(pl, "Buffered", None)


def _spec(shape, index_map, buffers=None):
    """BlockSpec with optional explicit buffer count (resident constants use 1)."""
    if buffers is not None and _BUFFERED is not None:
        try:
            return pl.BlockSpec(shape, index_map, pipeline_mode=_BUFFERED(buffers))
        except TypeError:           # older jax without pipeline_mode kwarg
            return pl.BlockSpec(shape, index_map)
    return pl.BlockSpec(shape, index_map)


# ---------------------------------------------------------------------------
# Wrapper
# ---------------------------------------------------------------------------
def se_block(x, w_down, b_down, w_up, b_up):
    """x: (N, C, H, W); w_down: (R, C, 1, 1); b_down: (R,);
       w_up: (C, R, 1, 1); b_up: (C,)  -- PyTorch Conv2d 1x1 parameter shapes."""
    N, C, H, W = x.shape
    R = w_down.shape[0]
    HW = H * W
    dtype = x.dtype
    itemsize = jnp.dtype(dtype).itemsize
    mib = 1024 * 1024

    # 1x1 convs on the pooled vector are dense layers; pre-transpose so the
    # kernel does (Nb,C)@(C,R) and (Nb,R)@(R,C).  Kept in f32 (tiny) so the
    # whole excitation path matches the f32 reference with a single rounding.
    wd_t = w_down.reshape(R, C).T.astype(jnp.float32)   # (C, R)
    wu_t = w_up.reshape(C, R).T.astype(jnp.float32)     # (R, C)
    bd = b_down.reshape(1, R).astype(jnp.float32)
    bu = b_up.reshape(1, C).astype(jnp.float32)

    # Lane-dense layout selection.
    channels_last = (HW % 128 != 0) and (C >= 128)
    if channels_last:
        x_flat = jnp.transpose(x.reshape(N, C, HW), (0, 2, 1))   # (N, HW, C)
        tail = (HW, C)
    else:
        x_flat = x.reshape(N, C, HW)                             # (N, C, HW)
        tail = (C, HW)

    max_block_bytes, vmem_limit, prefer_even, vmem_cap = _tpu_budgets()
    per_elem_bytes = C * HW * itemsize
    nb = _pick_batch_block(N, per_elem_bytes, max_block_bytes, prefer_even)
    grid = (N // nb,)

    # VMEM accounting: 2x in + 2x out double buffers + resident constants.
    block_bytes = nb * per_elem_bytes
    const_bytes = 4 * (2 * C * R + R + C)
    headroom = 1 * mib
    io_buffers = None                        # default double-buffering
    if 4 * block_bytes + const_bytes + headroom > vmem_limit:
        # Oversized single-batch-element tile (e.g. early-stage SE with large
        # H*W): single-buffer the big I/O blocks and raise the limit only as
        # far as needed so it still compiles instead of hitting a VMEM cliff.
        # TODO(synk): split into pool+excite and tiled-scale kernels to keep
        # double buffering for extreme (C, H*W) sizes.
        io_buffers = 1
        needed = 2 * block_bytes + const_bytes + headroom
        vmem_limit = max(vmem_limit, min(needed, vmem_cap - 4 * mib))

    in_specs = [
        _spec((nb,) + tail, lambda n: (n, 0, 0), buffers=io_buffers),
        _spec((C, R), lambda n: (0, 0), buffers=1),   # resident constants
        _spec((1, R), lambda n: (0, 0), buffers=1),
        _spec((R, C), lambda n: (0, 0), buffers=1),
        _spec((1, C), lambda n: (0, 0), buffers=1),
    ]
    out_spec = _spec((nb,) + tail, lambda n: (n, 0, 0), buffers=io_buffers)

    cost = pl.CostEstimate(
        flops=int(2 * N * C * HW + 4 * N * C * R),
        transcendentals=int(N * C),
        bytes_accessed=int(2 * N * C * HW * itemsize),
    )

    out_flat = pl.pallas_call(
        _make_se_kernel(channels_last),
        out_shape=jax.ShapeDtypeStruct((N,) + tail, dtype),
        grid_spec=pltpu.PrefetchScalarGridSpec(
            num_scalar_prefetch=0,
            grid=grid,
            in_specs=in_specs,
            out_specs=out_spec,
        ),
        compiler_params=pltpu.CompilerParams(
            dimension_semantics=("parallel",),
            vmem_limit_bytes=int(vmem_limit),
        ),
        cost_estimate=cost,
    )(x_flat, wd_t, bd, wu_t, bu)

    if channels_last:
        out_flat = jnp.transpose(out_flat, (0, 2, 1))
    return out_flat.reshape(N, C, H, W)


def se_block_ref(x, w_down, b_down, w_up, b_up):
    """Pure-JAX reference mirroring the PyTorch forward."""
    N, C, H, W = x.shape
    R = w_down.shape[0]
    pooled = jnp.mean(x.astype(jnp.float32), axis=(2, 3))          # (N, C)
    h = pooled @ w_down.reshape(R, C).T + b_down                   # (N, R)
    h = jnp.maximum(h, 0.0)
    s = h @ w_up.reshape(C, R).T + b_up                            # (N, C)
    s = jax.nn.sigmoid(s)
    return (x.astype(jnp.float32) * s[:, :, None, None]).astype(x.dtype)


if __name__ == "__main__":
    # Small shapes consistent with the module: N=2, C=4, H=W=16, internal=8
    N, C, H, W = 2, 4, 16, 16
    R = 8  # internal_neurons

    key = jax.random.PRNGKey(0)
    kx, kwd, kbd, kwu, kbu = jax.random.split(key, 5)

    x = jax.random.normal(kx, (N, C, H, W), dtype=jnp.float32)
    # Deterministic synthetic parameters (Conv2d 1x1 shapes).
    w_down = jax.random.normal(kwd, (R, C, 1, 1), dtype=jnp.float32) * 0.5
    b_down = jax.random.normal(kbd, (R,), dtype=jnp.float32) * 0.1
    w_up = jax.random.normal(kwu, (C, R, 1, 1), dtype=jnp.float32) * 0.5
    b_up = jax.random.normal(kbu, (C,), dtype=jnp.float32) * 0.1

    out = jax.block_until_ready(se_block(x, w_down, b_down, w_up, b_up))
    ref = se_block_ref(x, w_down, b_down, w_up, b_up)

    assert out.shape == (N, C, H, W)
    assert jnp.allclose(out, ref, atol=1e-4, rtol=1e-4), "mismatch vs reference"

    print("KERNEL_OK")
</pallas_src>

<mosaic_0001>
module attributes {stable_mosaic.version = 11 : i64} {
  func.func @se_kernel(%arg0: i32, %arg1: memref<1x4x256xf32, #tpu.memory_space<vmem>>, %arg2: memref<4x8xf32, #tpu.memory_space<vmem>>, %arg3: memref<1x8xf32, #tpu.memory_space<vmem>>, %arg4: memref<8x4xf32, #tpu.memory_space<vmem>>, %arg5: memref<1x4xf32, #tpu.memory_space<vmem>>, %arg6: memref<1x4x256xf32, #tpu.memory_space<vmem>>) attributes {dimension_semantics = [#tpu.dimension_semantics<parallel>], iteration_bounds = array<i64: 2>, scalar_prefetch = 0 : i64, scratch_operands = 0 : i64, tpu.core_type = #tpu.core_type<tc>, window_params = [{transform_indices = @transform_0, window_bounds = array<i64: 1, 4, 256>}, {pipeline_mode = #tpu.pipeline_mode<synchronous>, transform_indices = @transform_1, window_bounds = array<i64: 4, 8>}, {pipeline_mode = #tpu.pipeline_mode<synchronous>, transform_indices = @transform_2, window_bounds = array<i64: 1, 8>}, {pipeline_mode = #tpu.pipeline_mode<synchronous>, transform_indices = @transform_3, window_bounds = array<i64: 8, 4>}, {pipeline_mode = #tpu.pipeline_mode<synchronous>, transform_indices = @transform_4, window_bounds = array<i64: 1, 4>}, {transform_indices = @transform_5, window_bounds = array<i64: 1, 4, 256>}]} {
    %c0 = arith.constant 0 : index
    %c0_0 = arith.constant 0 : index
    %c0_1 = arith.constant 0 : index
    %0 = vector.load %arg1[%c0, %c0_0, %c0_1] : memref<1x4x256xf32, #tpu.memory_space<vmem>>, vector<1x4x256xf32>
    %cst = arith.constant 1.000000e+00 : f32
    %1 = vector.broadcast %cst : f32 to vector<1x256x1xf32>
    "tpu.trace_start"() <{level = 10 : i32, message = "bcl,blo->bco"}> : () -> ()
    %cst_2 = arith.constant dense<0.000000e+00> : vector<1x4x1xf32>
    %2 = tpu.matmul %0, %1, %cst_2 {dimension_numbers = #tpu.dot_dimension_numbers<[2], [1], [1], [2], [0, 0, 0, 1, 1, 2], [0], [0]>} : vector<1x4x256xf32>, vector<1x256x1xf32>, vector<1x4x1xf32> -> vector<1x4x1xf32>
    "tpu.trace_stop"() : () -> ()
    %3 = vector.shape_cast %2 : vector<1x4x1xf32> to vector<1x4xf32>
    %cst_3 = arith.constant 3.906250e-03 : f32
    %4 = vector.broadcast %cst_3 : f32 to vector<1x4xf32>
    %5 = arith.mulf %3, %4 : vector<1x4xf32>
    %c0_4 = arith.constant 0 : index
    %c0_5 = arith.constant 0 : index
    %6 = vector.load %arg2[%c0_4, %c0_5] : memref<4x8xf32, #tpu.memory_space<vmem>>, vector<4x8xf32>
    %cst_6 = arith.constant dense<0.000000e+00> : vector<1x8xf32>
    %7 = tpu.matmul %5, %6, %cst_6 {dimension_numbers = #tpu.dot_dimension_numbers<[1], [0], [0], [1], [0, 0, 1, 1], [], []>} : vector<1x4xf32>, vector<4x8xf32>, vector<1x8xf32> -> vector<1x8xf32>
    %c0_7 = arith.constant 0 : index
    %c0_8 = arith.constant 0 : index
    %8 = vector.load %arg3[%c0_7, %c0_8] : memref<1x8xf32, #tpu.memory_space<vmem>>, vector<1x8xf32>
    %9 = arith.addf %7, %8 : vector<1x8xf32>
    %cst_9 = arith.constant 0.000000e+00 : f32
    %10 = vector.broadcast %cst_9 : f32 to vector<1x8xf32>
    %11 = arith.maximumf %9, %10 : vector<1x8xf32>
    %c0_10 = arith.constant 0 : index
    %c0_11 = arith.constant 0 : index
    %12 = vector.load %arg4[%c0_10, %c0_11] : memref<8x4xf32, #tpu.memory_space<vmem>>, vector<8x4xf32>
    %cst_12 = arith.constant dense<0.000000e+00> : vector<1x4xf32>
    %13 = tpu.matmul %11, %12, %cst_12 {dimension_numbers = #tpu.dot_dimension_numbers<[1], [0], [0], [1], [0, 0, 1, 1], [], []>} : vector<1x8xf32>, vector<8x4xf32>, vector<1x4xf32> -> vector<1x4xf32>
    %c0_13 = arith.constant 0 : index
    %c0_14 = arith.constant 0 : index
    %14 = vector.load %arg5[%c0_13, %c0_14] : memref<1x4xf32, #tpu.memory_space<vmem>>, vector<1x4xf32>
    %15 = arith.addf %13, %14 : vector<1x4xf32>
    %16 = arith.negf %15 : vector<1x4xf32>
    %17 = math.exp %16 : vector<1x4xf32>
    %cst_15 = arith.constant 1.000000e+00 : f32
    %18 = vector.broadcast %cst_15 : f32 to vector<1x4xf32>
    %19 = arith.addf %18, %17 : vector<1x4xf32>
    %20 = arith.divf %18, %19 : vector<1x4xf32>
    %21 = vector.shape_cast %20 : vector<1x4xf32> to vector<1x4x1xf32>
    %22 = vector.broadcast %21 : vector<1x4x1xf32> to vector<1x4x256xf32>
    %23 = arith.mulf %0, %22 : vector<1x4x256xf32>
    %c0_16 = arith.constant 0 : index
    %c0_17 = arith.constant 0 : index
    %c0_18 = arith.constant 0 : index
    %24 = vector.load %arg6[%c0_16, %c0_17, %c0_18] : memref<1x4x256xf32, #tpu.memory_space<vmem>>, vector<1x4x256xf32>
    tpu.vector_store %arg6[%c0_16, %c0_17, %c0_18], %23 {strides = array<i32>} : memref<1x4x256xf32, #tpu.memory_space<vmem>>, vector<1x4x256xf32>,
    return
  }
  func.func @transform_0(%arg0: i32) -> (i32, i32, i32) {
    %c0_i32 = arith.constant 0 : i32
    %c0_i32_0 = arith.constant 0 : i32
    %c0_i32_1 = arith.constant 0 : i32
    return %arg0, %c0_i32, %c0_i32_0 : i32, i32, i32
  }
  func.func @transform_1(%arg0: i32) -> (i32, i32) {
    %c0_i32 = arith.constant 0 : i32
    %c0_i32_0 = arith.constant 0 : i32
    %c0_i32_1 = arith.constant 0 : i32
    return %c0_i32, %c0_i32_0 : i32, i32
  }
  func.func @transform_2(%arg0: i32) -> (i32, i32) {
    %c0_i32 = arith.constant 0 : i32
    %c0_i32_0 = arith.constant 0 : i32
    %c0_i32_1 = arith.constant 0 : i32
    return %c0_i32, %c0_i32_0 : i32, i32
  }
  func.func @transform_3(%arg0: i32) -> (i32, i32) {
    %c0_i32 = arith.constant 0 : i32
    %c0_i32_0 = arith.constant 0 : i32
    %c0_i32_1 = arith.constant 0 : i32
    return %c0_i32, %c0_i32_0 : i32, i32
  }
  func.func @transform_4(%arg0: i32) -> (i32, i32) {
    %c0_i32 = arith.constant 0 : i32
    %c0_i32_0 = arith.constant 0 : i32
    %c0_i32_1 = arith.constant 0 : i32
    return %c0_i32, %c0_i32_0 : i32, i32
  }
  func.func @transform_5(%arg0: i32) -> (i32, i32, i32) {
    %c0_i32 = arith.constant 0 : i32
    %c0_i32_0 = arith.constant 0 : i32
    %c0_i32_1 = arith.constant 0 : i32
    return %arg0, %c0_i32, %c0_i32_0 : i32, i32, i32
  }
}

</mosaic_0001>

<bundles_post_ra>
// kernel: tpu_custom_call.1
= control target key start
LH: loop header
LB: loop body
LE: loop exit
PB: predicated region body
PF: predicated region fallthrough
CT: control target
= control target key end

     0   :  { %10 = vsyncpa [#allocation3], 0  ;;  %s1051_s0 = inlined_call_operand.hbm [shape: f32[2,4,256], index: 0, kind: input, shape index: {}]   ;;  %s1052_s1 = inlined_call_operand.vmem [shape: f32[4,8], index: 1, kind: input, shape index: {}]   ;;  %s1053_s2 = inlined_call_operand.vmem [shape: f32[1,8], index: 2, kind: input, shape index: {}]   ;;  %s1054_s3 = inlined_call_operand.vmem [shape: f32[8,4], index: 3, kind: input, shape index: {}]   ;;  %s1055_s4 = inlined_call_operand.vmem [shape: f32[1,4], index: 4, kind: input, shape index: {}]   ;;  %s1056_s5 = inlined_call_operand.hbm [shape: f32[2,4,256], index: 5, kind: output, shape index: {}]  }
   0x1   :  { %12 = vsyncpa [#allocation3 + $0x1], 0 }
   0x2   :  { %13 = vsyncpa [#allocation4], 0 }
   0x3   :  { %15 = vsyncpa [#allocation4 + $0x1], 0  ;;  %s868_s18 = smov 0   ;;  %s870_s19 = smov 0  }
   0x4   :  { %s872_s20 = smov 0   ;;  %s874_s21 = smov 0  }
   0x5 LB: > { %s889_s22 = sadd.s32 4294967295, %s829_s21   ;;  %s591_s23 = sadd.s32 4294967294, %s829_s21   ;;  %s829_s21 = sphi %s874_s21, %s1071_s21   ;;  %s825_s20 = sphi %s872_s20, %s1070_s20   ;;  %s821_s19 = sphi %s870_s19, %s1069_s19   ;;  %s817_s18 = sphi %s868_s18, %s1068_s18  }
   0x6   : > { %s893_s24 = sadd.s32 1, %s829_s21   ;;  %s28_s25 = sadd.s32 1, %s825_s20 }
   0x7   : > { %s25_s26 = ssub.s32 %s829_s21, %s893_s24  ;;  %p35_p0 = scmp.ne.s32.totalorder %s825_s20, %s821_s19 }
   0x8   : > { %p26_p1 = scmp.eq.s32.totalorder %s25_s26, 0  ;;  %p36_p2 = scmp.eq.s32.totalorder %s829_s21, 0 }
   0x9   : > { %p41_p3 = scmp.ne.s32.totalorder %s821_s19, %s817_s18  ;;  %p42_p4 = scmp.eq.s32.totalorder %s889_s22, 0 }
   0xa   : > { %s905_s27 = scalar_select %p26_p1, %s825_s20, %s28_s25  }
   0xb   : > { %p907_p5 = por %p36_p2, %p35_p0  ;;  %p911_p6 = por %p42_p4, %p41_p3 }
   0xc   : > { %p149_p7 = scmp.eq.s32.totalorder %s889_s22, 1  ;;  %p155_p8 = scmp.eq.s32.totalorder %s591_s23, 1 }
   0xd   : > { %p688_p10 = scmp.lt.s32.totalorder %s829_s21, 2  ;;  %s187_s7 = sand.u32 1, %s825_s20  }
   0xe   : > { %p918_p11 = por %p149_p7, %p35_p0  ;;  %p922_p12 = por %p155_p8, %p41_p3 }
   0xf   : > { %s609_s8 = sshll.u32 %s829_s21, 7  ;;  %s594_s9 = sshll.u32 %s187_s7, 3 }
  0x10   : > { %s1060_s30 = scalar_select %p918_p11, 1, 0 }
  0x11   : > { %s1061_s6 = scalar_select %p922_p12, 1, 0 }
  0x12   : > { %s931_s12 = scalar_lea.hbm %s1051_s0, %s609_s8  ;;  %s191_s13 = scalar_lea.vmem [#allocation2], %s594_s9 }
  0x13   : > { %s199_s14 = sshll.u32 %s191_s13, 4  ;;  %p935_p13 = pnand %p688_p10, %p907_p5  ;;  %s939_s14 = int_to_ptr.vmem [resolvable:$true] %s199_s14 }
  0x14   : > { %s188_s16 = scalar_lea.sflag [#allocation3], %s187_s7  ;;  %s733_s17 = scalar_lea.hbm %s931_s12, 128 }
  0x15   : > { %p734_p2 = scmp.ne.s32.totalorder %s931_s12, %s733_s17  ;;  %p735_p3 = pneg %p935_p13 }
  0x16   : > { %s738_s26 = scalar_lea.hbm %s1051_s0, 256  ;;  %p739_p5 = scmp.lt.u32.totalorder %s931_s12, %s1051_s0 }
  0x17   : > { %p736_p4 = pnand %p735_p3, %p734_p2  ;;  %p740_p8 = scmp.lt.u32.totalorder %s738_s26, %s733_s17 }
  0x18   : > { %p742_p9 = scmp.lt.u32.totalorder %s733_s17, %s931_s12 }
  0x19   : > { %p737_p7 = pneg %p736_p4  ;;  %p741_p10 = por %p740_p8, %p739_p5 }
  0x1b   : > { %p743_p0 = por %p742_p9, %p741_p10 }
  0x1d   : > { %p744_p1 = pnand %p743_p0, %p737_p7 }
  0x1f   : > { %747 = shalt.err (!%p744_p1)
}
  0x20   : > { %s748_s7 = scalar_lea.vmem %s939_s14, 128  ;;  %s831_s9 = smov [#allocation2]  }
  0x21   : > { %p749_p2 = scmp.ne.s32.totalorder %s939_s14, %s748_s7  ;;  %s753_s10 = sshll.u32 %s831_s9, 4  ;;  %s754_s10 = int_to_ptr.vmem [resolvable:$false] %s753_s10 }
  0x22   : > { %s755_s11 = scalar_lea.vmem %s754_s10, 256  ;;  %p756_p11 = scmp.lt.s32.totalorder %s939_s14, %s754_s10 }
  0x23   : > { %p751_p4 = pnand %p749_p2, %p735_p3  ;;  %p757_p5 = scmp.lt.s32.totalorder %s755_s11, %s748_s7 }
  0x25   : > { %p752_p12 = pneg %p751_p4  ;;  %p758_p8 = por %p757_p5, %p756_p11 }
  0x27   : > { %p759_p9 = pnand %p758_p8, %p752_p12 }
  0x29   : > { %762 = shalt.err (!%p759_p9)
}
  0x2a   : > { %683 = dma.hbm_to_vmem [thread:$0]  (!%p935_p13), %s931_s12, 128, %s939_s14, %s188_s16  }
  0x2b   : > { %p1063_p0 = scmp.lt.s32.totalorder %s829_s21, 3  ;;  %p1064_p1 = scmp.ge.s32.totalorder %s829_s21, 1 }
  0x2d   : > { %p205_p3 = pnand %p1064_p1, %p1063_p0 }
  0x2e   : > { %s973_s13 = sand.u32 (!%p205_p3), 1, %s821_s19  }
  0x2f   : > { %208 = sbr.rel (%p205_p3) target bundleno = 1026 (0x402), region = 40  ;;  %s598_s17 = sshll.u32 (!%p205_p3), %s973_s13, 3 }
  0x30   : > { %s211_s23 = scalar_lea.sflag (!%p205_p3), [#allocation3], %s973_s13  ;;  %s214_s15 = scalar_lea.vmem (!%p205_p3), [#allocation2], %s598_s17 }
  0x36   : > { %808 = dma.done.wait (%p911_p6), %s211_s23, 128  }
  0x37   : > { %810 = vsyncadd (%p911_p6), %s211_s23, 4294967168  ;;  %v832_v0 = vmov 1.0|1.0   ;;  %v983_v1 = vld [vmem:[%s214_s15] sm:$0xff]  ;;  %v833_v3 = vmov 0   ;;  %v834_v8 = vmov 0.0   ;;  %v322_v10 = vlaneseq }
  0x38   : > { %660 = vmatprep.subr.bf16.mxu0 %v832_v0  ;;  %v243_v2 = vcombine.high %v983_v1, %v983_v1  ;;  %727 = vset.pattern.permute.xlu0 %v833_v3  ;;  %v316_v9 = vld [vmem:[%s1052_s1] sm:$0xf]  ;;  %vm331_vm0 = vcmask 1043456   ;;  %vm835_vm1 = vmmov 0   ;;  %vm328_vm2 = vcmask 31744   ;;  %s610_s7 = sshll.u32 %s889_s22, 7 }
  0x39   : > { %661 = vmatpush3.bf16.msra.mxu0 %v832_v0  ;;  %650 = vmatprep.subr.mxu1 %v834_v8  ;;  %v323_v11 = vand.u32 127, %v322_v10  ;;  %v325_v12 = vshrl.u32 %v322_v10, 7  ;;  %v406_v16 = vld [vmem:[%s1054_s3] sm:$0xff]  ;;  %vm408_vm3 = vcmask 64512   ;;  %v836_v32 = vmov 839922192   ;;  %s1007_s15 = scalar_lea.hbm %s1056_s5, %s610_s7 }
  0x3a   : > { %662 = vmatprep.subr.bf16.mxu0 %v832_v0  ;;  %309 = vmatprep.mubr.f32.mxu0 %v243_v2  ;;  %v317_v17 = vld [vmem:[%s1053_s2] sm:$0x1]  ;;  %v497_v33 = vunpack.c.l.s4 %v836_v32  ;;  %s240_s9 = scalar_lea.vmem [#allocation5], %s598_s17  ;;  %s507_s29 = scalar_lea.sflag [#allocation4], %s973_s13 }
  0x3b   : > { %651 = vmatpush3.msk.msra.mxu1 %vm331_vm0, %v316_v9  ;;  %652 = vmatprep.mubr.msk.f32.mxu1 %vm835_vm1, %v834_v8  ;;  %v326_v13 = vsub.s32 %v323_v11, %v325_v12  ;;  %v407_v22 = vld [vmem:[%s1055_s4] sm:$0x1]  ;;  %v490_v29 = vsub.s32 0, %v325_v12  ;;  %s521_s10 = sshll.u32 %s240_s9, 4  ;;  %p1065_p11 = scmp.ne.s32.totalorder %s1060_s30, 0  ;;  %s1009_s10 = int_to_ptr.vmem [resolvable:$true] %s521_s10 }
  0x3c   : > { %655 = vmatprep.subr.mxu1 %v834_v8  ;;  %v498_v34 = vunpack.c.0.s8 %v497_v33  ;;  %s763_s12 = scalar_lea.vmem %s1009_s10, 128  ;;  %s837_s22 = smov [#allocation5]  }
  0x3d   : > { %663 = vmatpush3.bf16.msra.mxu0 %v832_v0  ;;  %p764_p6 = scmp.ne.s32.totalorder %s1009_s10, %s763_s12  ;;  %s767_s17 = sshll.u32 %s837_s22, 4  ;;  %s768_s17 = int_to_ptr.vmem [resolvable:$false] %s767_s17 }
  0x3e   : > { %664 = vmatprep.subr.bf16.mxu0 %v832_v0  ;;  %v501_v35 = vsub.s32 %v498_v34, %v325_v12  ;;  %s769_s14 = scalar_lea.vmem %s768_s17, 256  ;;  %p770_p7 = scmp.lt.s32.totalorder %s1009_s10, %s768_s17 }
  0x3f   : > { %p765_p12 = pnand %p764_p6, %p1065_p11  ;;  %p771_p10 = scmp.lt.s32.totalorder %s769_s14, %s763_s12 }
  0x41   : > { %665 = vmatpush3.bf16.msra.mxu0 %v832_v0  ;;  %p766_p13 = pneg %p765_p12  ;;  %p772_p2 = por %p771_p10, %p770_p7 }
  0x42   : > { %666 = vmatprep.subr.bf16.mxu0 %v832_v0 }
  0x43   : > { %p773_p4 = pnand %p772_p2, %p766_p13 }
  0x45   : > { %667 = vmatpush3.bf16.msra.mxu0 %v832_v0 }
  0x46   : > { %668 = vmatprep.subr.bf16.mxu0 %v832_v0 }
  0x49   : > { %669 = vmatpush3.bf16.msra.mxu0 %v832_v0 }
  0x4a   : > { %670 = vmatprep.subr.bf16.mxu0 %v832_v0 }
  0x4d   : > { %671 = vmatpush3.bf16.msra.mxu0 %v832_v0 }
  0x4e   : > { %672 = vmatprep.subr.bf16.mxu0 %v832_v0 }
  0x51   : > { %673 = vmatpush3.bf16.msra.mxu0 %v832_v0 }
  0x52   : > { %674 = vmatprep.subr.bf16.mxu0 %v832_v0 }
  0x55   : > { %675 = vmatpush3.bf16.msra.mxu0 %v832_v0 }
  0x58   : > { %310 = vmatmul.mubr.f32.vlgmr.msra.gmra.mrb[0].mxu0 %v983_v1 }
 0x12b   : > { %v643_v4 = vpop.f32.mrb[0].mxu0 }
 0x12c   : > { %v644_v5 = vpop.f32.mrb[1].mxu0 }
 0x12d   : > { %v645_v6 = vadd.f32 %v644_v5, %v643_v4 }
 0x12f   : > { %v315_v7 = vmul.f32 0.00390625, %v645_v6 }
 0x131   : > { %320 = vperm.xlu0 %727, %v315_v7  }
 0x1b0   : > { %v321_v14 = vpop.permute.xlu0 %320 }
 0x1b1   : > { %v327_v15 = vrot.slane %v321_v14, %v326_v13 }
 0x1b3   : > { %653 = vmatmul.mubr.msk.f32.vlgmr.msra.gmra.mrb[0].mxu1 %vm328_vm2, %v327_v15 }
 0x1b4   : > { %657 = vmatprep.mubr.msk.f32.mxu1 %vm835_vm1, %v834_v8  ;;  %656 = vmatpush3.msra.mxu1 %v406_v16 }
 0x286   : > { %v401_v18 = vpop.f32.mrb[0].mxu1 }
 0x287   : > { %v402_v19 = vadd.f32 %v401_v18, %v317_v17  ;;  %v654_v20 = vpop.f32.mrb[1].mxu1 }
 0x289   : > { %v405_v21 = vmax.f32 %v402_v19, 0.0 }
 0x28b   : > { %658 = vmatmul.mubr.msk.f32.vlgmr.msra.gmra.mrb[2].mxu1 %vm408_vm3, %v405_v21 }
 0x35e   : > { %v478_v23 = vpop.f32.mrb[2].mxu1 }
 0x35f   : > { %v479_v24 = vadd.f32 %v478_v23, %v407_v22  ;;  %v659_v25 = vpop.f32.mrb[3].mxu1 }
 0x361   : > { %v603_v26 = vmul.f32 -1.442695, %v479_v24 }
 0x363   : > { %729 = vpow2.f32 %v603_v26 }
 0x36d   : > { %v730_v27 = vpop.eup %729 }
 0x36e   : > { %v485_v28 = vadd.f32 1.0, %v730_v27 }
 0x370   : > { %731 = vrcp.f32 %v485_v28 }
 0x37a   : > { %v732_v30 = vpop.eup %731 }
 0x37b   : > { %v491_v31 = vrot.slane %v732_v30, %v490_v29 }
 0x37d   : > { %493 = vbcast.lane.b32.xlu0 %v491_v31, 256 }
 0x3ef   : > { %v494_v36 = vpop.permute.xlu0 %493 }
 0x3f0   : > { %v502_v37 = vrot.slane %v494_v36, %v501_v35 }
 0x3f2   : > { %v504_v38 = vmul.f32 %v502_v37, %v983_v1 }
 0x3f4   : > { %505 = vst [vmem:[%s240_s9] sm:$0xff] %v504_v38 }
 0x3f5   : > { %776 = shalt.err (!%p773_p4)
}
 0x3f6   : > { %s777_s13 = scalar_lea.hbm %s1007_s15, 128  ;;  %s781_s26 = scalar_lea.hbm %s1056_s5, 256 }
 0x3f7   : > { %p778_p5 = scmp.ne.s32.totalorder %s1007_s15, %s777_s13  ;;  %p782_p0 = scmp.lt.u32.totalorder %s1007_s15, %s1056_s5 }
 0x3f8   : > { %p783_p1 = scmp.lt.u32.totalorder %s781_s26, %s777_s13  ;;  %p785_p6 = scmp.lt.u32.totalorder %s777_s13, %s1007_s15 }
 0x3f9   : > { %p779_p8 = pnand %p778_p5, %p1065_p11 }
 0x3fa   : > { %p784_p3 = por %p783_p1, %p782_p0 }
 0x3fb   : > { %p780_p9 = pneg %p779_p8 }
 0x3fc   : > { %p786_p12 = por %p785_p6, %p784_p3 }
 0x3fe   : > { %p787_p13 = pnand %p786_p12, %p780_p9 }
 0x400   : > { %790 = shalt.err (!%p787_p13)
}
 0x401   : > { %678 = dma.vmem_to_hbm [thread:$0]  (%p1065_p11), %s1009_s10, 128, %s1007_s15, %s507_s29  }
 0x402 PF: > { %s533_s7 = sand.u32 1, %s817_s18   ;;  %p1066_p7 = scmp.ne.s32.totalorder %s1061_s6, 0 }
 0x403   : > { %p1067_p10 = scmp.ge.s32.totalorder %s829_s21, 2  ;;  %s534_s9 = scalar_lea.sflag [#allocation4], %s533_s7 }
 0x405   : > { %p685_p2 = pnand %p1067_p10, %p1066_p7 }
 0x407   : > { %812 = dma.done.wait (!%p685_p2), %s534_s9, 128  }
 0x408   : > { %814 = vsyncadd (!%p685_p2), %s534_s9, 4294967168  ;;  %p18_p4 = scmp.ge.s32.totalorder %s893_s24, 4   ;;  %s1068_s18 = smov %s821_s19 }
 0x409   : > { %s1069_s19 = smov %s825_s20  ;;  %s1070_s20 = smov %s905_s27 }
 0x40a   : > { %s1071_s21 = smov %s893_s24  ;;  %20 = sbr.rel (!%p18_p4) target bundleno = 5 (0x5), region = 85 }
 0x411   :  { %539 = vsyncpa [#allocation3], 1 }
 0x412   :  { %541 = vsyncpa [#allocation3 + $0x1], 1 }
 0x413   :  { %542 = vsyncpa [#allocation4], 1 }
 0x414   :  { %544 = vsyncpa [#allocation4 + $0x1], 1 }

</bundles_post_ra>
